<compile_context>
chip_gen: v5e
topology: v5e:2x2
jax: 0.10.0
libtpu: 0.0.40
codegen_flags: <defaults>
</compile_context>

<pallas_src>
import functools

import jax
import jax.numpy as jnp
from jax.experimental import pallas as pl
from jax.experimental.pallas import tpu as pltpu


def _mixprop_kernel(x_ref, a_ref, w_ref, b_ref, o_ref, h_ref, *,
                    gdep, alpha, c_in, mxu_dtype):
    # x_ref: (C, T, V)              activation tile, nodes V on the lane axis
    # a_ref: (V, V)                 pre-normalized adjacency (adj+I, row-norm)
    # w_ref: (c_out, (gdep+1)*C)    unsplit 1x1-conv weight
    # b_ref: (c_out, 1)             1x1-conv bias (f32)
    # o_ref: (c_out, T, V)
    # h_ref: VMEM scratch ((gdep+1)*C, T, V) in mxu_dtype -- stacked hops
    x_f32 = x_ref[...].astype(jnp.float32)                  # (C, T, V)
    a = a_ref[...]                                           # (V, V) mxu_dtype

    # hop 0: h0 = x  (staged into the stacked-H scratch, channel-major)
    h_ref[pl.ds(0, c_in)] = x_f32.astype(mxu_dtype)

    # graph propagation:
    #   h_k[c,m,w] = alpha*x[c,m,w] + (1-alpha)*sum_v h_{k-1}[c,m,v]*a[v,w]
    # The matmul lhs is read back from the scratch (already mxu_dtype) so only
    # one hop tile plus blend temporaries are live in vregs at any time.
    for k in range(1, gdep + 1):
        h_prev = h_ref[pl.ds((k - 1) * c_in, c_in)]          # (C, T, V)
        hv = jax.lax.dot_general(
            h_prev, a, (((2,), (0,)), ((), ())),
            preferred_element_type=jnp.float32)              # (C, T, V) f32
        h = alpha * x_f32 + (1.0 - alpha) * hv               # blend stays f32
        h_ref[pl.ds(k * c_in, c_in)] = h.astype(mxu_dtype)

    # Fused 1x1 conv over the concatenated hops: one matmul, K=(gdep+1)*C.
    y = jax.lax.dot_general(
        w_ref[...], h_ref[...], (((1,), (0,)), ((), ())),
        preferred_element_type=jnp.float32)                  # (c_out, T, V)
    y = y + b_ref[...][:, :, None]
    # NOTE: with V < 128 this store is lane-masked; at production V >= 128 it
    # is a dense vst with no code change (see header).
    o_ref[...] = y.astype(o_ref.dtype)


def _nl_tile_cap():
    # v5e/v6e: 128 MiB VMEM -> ~512-row tiles; v7x: 64 MiB -> halve the cap.
    try:
        vmem = pltpu.get_tpu_info().vmem_capacity_bytes
        return 512 if vmem >= (96 << 20) else 256
    except Exception:
        return 512


def _pick_nl_tile(nl, cap):
    if nl <= cap:
        return nl
    start = cap - (cap % 8)
    for t in range(start, 7, -8):
        if nl % t == 0:
            return t
    return nl  # no multiple-of-8 divisor: fall back to one full-extent block


def mixprop_forward(x, adj, weight, bias, *, gdep, alpha,
                    mxu_dtype=jnp.bfloat16, nl_tile=None):
    """x: (N, C, V, L), adj: (V, V), weight: (c_out, (gdep+1)*C), bias: (c_out,)."""
    N, C, V, L = x.shape
    c_out, c_tot = weight.shape
    assert c_tot == (gdep + 1) * C
    NL = N * L

    # Hoisted, batch-independent adjacency normalization (done once).
    a = adj + jnp.eye(V, dtype=adj.dtype)
    a = (a / jnp.sum(a, axis=1, keepdims=True)).astype(mxu_dtype)

    # Fold the batch: layout (C, N*L, V); nodes last so propagation is the
    # proven last-dim x first-dim dot_general pattern.
    # TODO(synk): at production scale make (C, NL, V) the native activation
    # layout (or fuse these transposes into adjacent ops) -- each is an extra
    # HBM round trip outside the kernel.
    x_k = jnp.transpose(x, (1, 0, 3, 2)).reshape(C, NL, V)

    w_k = weight.astype(mxu_dtype)   # channel order already matches stacked H
    b_k = bias.reshape(c_out, 1).astype(jnp.float32)

    if nl_tile is None:
        nl_tile = _pick_nl_tile(NL, _nl_tile_cap())
    assert NL % nl_tile == 0
    assert nl_tile % 8 == 0 or nl_tile == NL
    grid = (NL // nl_tile,)

    # VMEM budget: double-buffered x/out tiles + stacked-H scratch + constants.
    in_b = x.dtype.itemsize
    mxu_b = jnp.dtype(mxu_dtype).itemsize
    need = (2 * (C + c_out) * nl_tile * V * in_b
            + c_tot * nl_tile * V * mxu_b
            + 2 * (V * V + c_out * c_tot) * mxu_b + 4 * c_out)
    vmem_limit = int(min(max(4 * need, 16 << 20), 64 << 20))

    kernel = functools.partial(_mixprop_kernel, gdep=gdep, alpha=alpha,
                               c_in=C, mxu_dtype=mxu_dtype)

    out_k = pl.pallas_call(
        kernel,
        out_shape=jax.ShapeDtypeStruct((c_out, NL, V), x.dtype),
        grid_spec=pltpu.PrefetchScalarGridSpec(
            num_scalar_prefetch=0,
            grid=grid,
            in_specs=[
                pl.BlockSpec((C, nl_tile, V), lambda i: (0, i, 0)),
                pl.BlockSpec((V, V), lambda i: (0, 0)),           # VMEM-resident
                pl.BlockSpec((c_out, c_tot), lambda i: (0, 0)),   # VMEM-resident
                pl.BlockSpec((c_out, 1), lambda i: (0, 0)),       # VMEM-resident
            ],
            out_specs=pl.BlockSpec((c_out, nl_tile, V), lambda i: (0, i, 0)),
            scratch_shapes=[pltpu.VMEM((c_tot, nl_tile, V), mxu_dtype)],
        ),
        compiler_params=pltpu.CompilerParams(
            dimension_semantics=("parallel",),   # tiles independent -> megacore
            vmem_limit_bytes=vmem_limit,
        ),
    )(x_k, a, w_k, b_k)

    # (c_out, N*L, V) -> (N, c_out, V, L)
    return jnp.transpose(out_k.reshape(c_out, N, L, V), (1, 0, 3, 2))


def mixprop_reference(x, adj, weight, bias, *, gdep, alpha):
    """Pure-JAX reference matching the PyTorch forward exactly."""
    V = adj.shape[0]
    adj = adj + jnp.eye(V, dtype=adj.dtype)
    d = adj.sum(axis=1)
    a = adj / d[:, None]
    h = x
    outs = [h]
    for _ in range(gdep):
        h = alpha * x + (1.0 - alpha) * jnp.einsum('ncvl,vw->ncwl', h, a)
        outs.append(h)
    ho = jnp.concatenate(outs, axis=1)
    y = jnp.einsum('oi,nivl->novl', weight, ho) + bias[None, :, None, None]
    return y


if __name__ == "__main__":
    # small shapes consistent with the module
    N, C_IN, V, L = 2, 4, 16, 16
    GDEP, C_OUT = 2, 8
    ALPHA = 0.05
    # dropout is a ctor arg of mixprop but unused in forward -> nothing to do.

    key = jax.random.PRNGKey(0)
    kx, kadj, kw, kb = jax.random.split(key, 4)

    x = jax.random.normal(kx, (N, C_IN, V, L), dtype=jnp.float32)
    adj = jax.random.uniform(kadj, (V, V), dtype=jnp.float32)

    # Conv2d((gdep+1)*c_in, c_out, 1x1) params, deterministic init
    c_tot = (GDEP + 1) * C_IN
    bound = 1.0 / (c_tot ** 0.5)
    weight = jax.random.uniform(kw, (C_OUT, c_tot), dtype=jnp.float32,
                                minval=-bound, maxval=bound)
    bias = jax.random.uniform(kb, (C_OUT,), dtype=jnp.float32,
                              minval=-bound, maxval=bound)

    ref = mixprop_reference(x, adj, weight, bias, gdep=GDEP, alpha=ALPHA)

    # Exact path (f32 MXU operands); nl_tile=16 forces a 2-step pipelined grid
    # even at this toy size.
    out = mixprop_forward(x, adj, weight, bias, gdep=GDEP, alpha=ALPHA,
                          mxu_dtype=jnp.float32, nl_tile=16)
    out = jax.block_until_ready(out)
    assert out.shape == (N, C_OUT, V, L)
    assert jnp.allclose(out, ref, atol=1e-4, rtol=1e-4), "f32 path mismatch"

    # Production precision path for v6e/v7x: bf16 MXU operands, f32 accumulate
    # and f32 alpha-blend.  Tolerance loosened only because operands are bf16.
    out_bf = mixprop_forward(x, adj, weight, bias, gdep=GDEP, alpha=ALPHA,
                             mxu_dtype=jnp.bfloat16, nl_tile=16)
    out_bf = jax.block_until_ready(out_bf)
    max_err = float(jnp.max(jnp.abs(out_bf - ref)))
    assert max_err < 1e-1, f"bf16 path error too large: {max_err}"

    print("KERNEL_OK")
</pallas_src>

<mosaic_0001>
module attributes {stable_mosaic.version = 11 : i64} {
  func.func @_mixprop_kernel(%arg0: i32, %arg1: memref<4x16x16xf32, #tpu.memory_space<vmem>>, %arg2: memref<16x16xf32, #tpu.memory_space<vmem>>, %arg3: memref<8x12xf32, #tpu.memory_space<vmem>>, %arg4: memref<8x1xf32, #tpu.memory_space<vmem>>, %arg5: memref<8x16x16xf32, #tpu.memory_space<vmem>>, %arg6: memref<12x16x16xf32, #tpu.memory_space<vmem>>) attributes {dimension_semantics = [#tpu.dimension_semantics<parallel>], iteration_bounds = array<i64: 2>, scalar_prefetch = 0 : i64, scratch_operands = 1 : i64, tpu.core_type = #tpu.core_type<tc>, window_params = [{transform_indices = @transform_0, window_bounds = array<i64: 4, 16, 16>}, {pipeline_mode = #tpu.pipeline_mode<synchronous>, transform_indices = @transform_1, window_bounds = array<i64: 16, 16>}, {pipeline_mode = #tpu.pipeline_mode<synchronous>, transform_indices = @transform_2, window_bounds = array<i64: 8, 12>}, {pipeline_mode = #tpu.pipeline_mode<synchronous>, transform_indices = @transform_3, window_bounds = array<i64: 8, 1>}, {transform_indices = @transform_4, window_bounds = array<i64: 8, 16, 16>}]} {
    %c0 = arith.constant 0 : index
    %c0_0 = arith.constant 0 : index
    %c0_1 = arith.constant 0 : index
    %0 = vector.load %arg1[%c0, %c0_0, %c0_1] : memref<4x16x16xf32, #tpu.memory_space<vmem>>, vector<4x16x16xf32>
    %c0_2 = arith.constant 0 : index
    %c0_3 = arith.constant 0 : index
    %1 = vector.load %arg2[%c0_2, %c0_3] : memref<16x16xf32, #tpu.memory_space<vmem>>, vector<16x16xf32>
    %c0_4 = arith.constant 0 : index
    %c0_5 = arith.constant 0 : index
    %c0_6 = arith.constant 0 : index
    %2 = vector.load %arg6[%c0_4, %c0_5, %c0_6] : memref<12x16x16xf32, #tpu.memory_space<vmem>>, vector<4x16x16xf32>
    tpu.vector_store %arg6[%c0_4, %c0_5, %c0_6], %0 {strides = array<i32>} : memref<12x16x16xf32, #tpu.memory_space<vmem>>, vector<4x16x16xf32>,
    %c0_7 = arith.constant 0 : index
    %c0_8 = arith.constant 0 : index
    %c0_9 = arith.constant 0 : index
    %3 = vector.load %arg6[%c0_7, %c0_8, %c0_9] : memref<12x16x16xf32, #tpu.memory_space<vmem>>, vector<4x16x16xf32>
    %cst = arith.constant dense<0.000000e+00> : vector<4x16x16xf32>
    %4 = tpu.matmul %3, %1, %cst {dimension_numbers = #tpu.dot_dimension_numbers<[2], [0], [0, 1], [1], [0, 0, 0, 1, 1, 1], [], []>} : vector<4x16x16xf32>, vector<16x16xf32>, vector<4x16x16xf32> -> vector<4x16x16xf32>
    %cst_10 = arith.constant 5.000000e-02 : f32
    %5 = vector.broadcast %cst_10 : f32 to vector<4x16x16xf32>
    %6 = arith.mulf %5, %0 : vector<4x16x16xf32>
    %cst_11 = arith.constant 0.949999988 : f32
    %7 = vector.broadcast %cst_11 : f32 to vector<4x16x16xf32>
    %8 = arith.mulf %7, %4 : vector<4x16x16xf32>
    %9 = arith.addf %6, %8 : vector<4x16x16xf32>
    %c4 = arith.constant 4 : index
    %c0_12 = arith.constant 0 : index
    %c0_13 = arith.constant 0 : index
    %10 = vector.load %arg6[%c4, %c0_12, %c0_13] : memref<12x16x16xf32, #tpu.memory_space<vmem>>, vector<4x16x16xf32>
    tpu.vector_store %arg6[%c4, %c0_12, %c0_13], %9 {strides = array<i32>} : memref<12x16x16xf32, #tpu.memory_space<vmem>>, vector<4x16x16xf32>,
    %c4_14 = arith.constant 4 : index
    %c0_15 = arith.constant 0 : index
    %c0_16 = arith.constant 0 : index
    %11 = vector.load %arg6[%c4_14, %c0_15, %c0_16] : memref<12x16x16xf32, #tpu.memory_space<vmem>>, vector<4x16x16xf32>
    %cst_17 = arith.constant dense<0.000000e+00> : vector<4x16x16xf32>
    %12 = tpu.matmul %11, %1, %cst_17 {dimension_numbers = #tpu.dot_dimension_numbers<[2], [0], [0, 1], [1], [0, 0, 0, 1, 1, 1], [], []>} : vector<4x16x16xf32>, vector<16x16xf32>, vector<4x16x16xf32> -> vector<4x16x16xf32>
    %cst_18 = arith.constant 5.000000e-02 : f32
    %13 = vector.broadcast %cst_18 : f32 to vector<4x16x16xf32>
    %14 = arith.mulf %13, %0 : vector<4x16x16xf32>
    %cst_19 = arith.constant 0.949999988 : f32
    %15 = vector.broadcast %cst_19 : f32 to vector<4x16x16xf32>
    %16 = arith.mulf %15, %12 : vector<4x16x16xf32>
    %17 = arith.addf %14, %16 : vector<4x16x16xf32>
    %c8 = arith.constant 8 : index
    %c0_20 = arith.constant 0 : index
    %c0_21 = arith.constant 0 : index
    %18 = vector.load %arg6[%c8, %c0_20, %c0_21] : memref<12x16x16xf32, #tpu.memory_space<vmem>>, vector<4x16x16xf32>
    tpu.vector_store %arg6[%c8, %c0_20, %c0_21], %17 {strides = array<i32>} : memref<12x16x16xf32, #tpu.memory_space<vmem>>, vector<4x16x16xf32>,
    %c0_22 = arith.constant 0 : index
    %c0_23 = arith.constant 0 : index
    %19 = vector.load %arg3[%c0_22, %c0_23] : memref<8x12xf32, #tpu.memory_space<vmem>>, vector<8x12xf32>
    %c0_24 = arith.constant 0 : index
    %c0_25 = arith.constant 0 : index
    %c0_26 = arith.constant 0 : index
    %20 = vector.load %arg6[%c0_24, %c0_25, %c0_26] : memref<12x16x16xf32, #tpu.memory_space<vmem>>, vector<12x16x16xf32>
    %cst_27 = arith.constant dense<0.000000e+00> : vector<8x16x16xf32>
    %21 = tpu.matmul %19, %20, %cst_27 {dimension_numbers = #tpu.dot_dimension_numbers<[1], [0], [0], [1, 2], [0, 0, 1, 1, 1, 2], [], []>} : vector<8x12xf32>, vector<12x16x16xf32>, vector<8x16x16xf32> -> vector<8x16x16xf32>
    %c0_28 = arith.constant 0 : index
    %c0_29 = arith.constant 0 : index
    %22 = vector.load %arg4[%c0_28, %c0_29] : memref<8x1xf32, #tpu.memory_space<vmem>>, vector<8x1xf32>
    %23 = vector.shape_cast %22 : vector<8x1xf32> to vector<8x1x1xf32>
    %24 = vector.broadcast %23 : vector<8x1x1xf32> to vector<8x16x16xf32>
    %25 = arith.addf %21, %24 : vector<8x16x16xf32>
    %c0_30 = arith.constant 0 : index
    %c0_31 = arith.constant 0 : index
    %c0_32 = arith.constant 0 : index
    %26 = vector.load %arg5[%c0_30, %c0_31, %c0_32] : memref<8x16x16xf32, #tpu.memory_space<vmem>>, vector<8x16x16xf32>
    tpu.vector_store %arg5[%c0_30, %c0_31, %c0_32], %25 {strides = array<i32>} : memref<8x16x16xf32, #tpu.memory_space<vmem>>, vector<8x16x16xf32>,
    return
  }
  func.func @transform_0(%arg0: i32) -> (i32, i32, i32) {
    %c0_i32 = arith.constant 0 : i32
    %c0_i32_0 = arith.constant 0 : i32
    %c0_i32_1 = arith.constant 0 : i32
    return %c0_i32, %arg0, %c0_i32_0 : i32, i32, i32
  }
  func.func @transform_1(%arg0: i32) -> (i32, i32) {
    %c0_i32 = arith.constant 0 : i32
    %c0_i32_0 = arith.constant 0 : i32
    %c0_i32_1 = arith.constant 0 : i32
    return %c0_i32, %c0_i32_0 : i32, i32
  }
  func.func @transform_2(%arg0: i32) -> (i32, i32) {
    %c0_i32 = arith.constant 0 : i32
    %c0_i32_0 = arith.constant 0 : i32
    %c0_i32_1 = arith.constant 0 : i32
    return %c0_i32, %c0_i32_0 : i32, i32
  }
  func.func @transform_3(%arg0: i32) -> (i32, i32) {
    %c0_i32 = arith.constant 0 : i32
    %c0_i32_0 = arith.constant 0 : i32
    %c0_i32_1 = arith.constant 0 : i32
    return %c0_i32, %c0_i32_0 : i32, i32
  }
  func.func @transform_4(%arg0: i32) -> (i32, i32, i32) {
    %c0_i32 = arith.constant 0 : i32
    %c0_i32_0 = arith.constant 0 : i32
    %c0_i32_1 = arith.constant 0 : i32
    return %c0_i32, %arg0, %c0_i32_0 : i32, i32, i32
  }
}

</mosaic_0001>

<bundles_post_ra>
// kernel: tpu_custom_call.1
= control target key start
LH: loop header
LB: loop body
LE: loop exit
PB: predicated region body
PF: predicated region fallthrough
CT: control target
= control target key end

     0   :  { %s1851_s15 = smov 0   ;;  %s1853_s16 = smov 0   ;;  %s2558_s0 = inlined_call_operand.vmem [shape: f32[4,32,16], index: 0, kind: input, shape index: {}]   ;;  %s2559_s1 = inlined_call_operand.vmem [shape: f32[16,16], index: 1, kind: input, shape index: {}]   ;;  %s2560_s2 = inlined_call_operand.vmem [shape: f32[8,12], index: 2, kind: input, shape index: {}]   ;;  %s2561_s3 = inlined_call_operand.vmem [shape: f32[8,1], index: 3, kind: input, shape index: {}]   ;;  %s2562_s4 = inlined_call_operand.vmem [shape: f32[8,32,16], index: 4, kind: output, shape index: {}]  }
   0x1   :  { %s1855_s17 = smov 0  }
   0x2 LB: > { %s1679_s18 = sadd.s32 4294967295, %s1814_s17   ;;  %s1868_s19 = sadd.s32 1, %s1814_s17   ;;  %s1814_s17 = sphi %s1855_s17, %s2566_s17   ;;  %s1810_s16 = sphi %s1853_s16, %s2565_s16   ;;  %s1806_s15 = sphi %s1851_s15, %s2564_s15  }
   0x3   : > { %s18_s20 = ssub.s32 %s1814_s17, %s1868_s19  ;;  %s21_s21 = sadd.s32 1, %s1810_s16 }
   0x4   : > { %p19_p0 = scmp.eq.s32.totalorder %s18_s20, 0  ;;  %p28_p1 = scmp.ne.s32.totalorder %s1810_s16, %s1806_s15 }
   0x5   : > { %p29_p2 = scmp.eq.s32.totalorder %s1814_s17, 0  ;;  %p121_p3 = scmp.eq.s32.totalorder %s1679_s18, 1 }
   0x6   : > { %s1879_s22 = scalar_select %p19_p0, %s1810_s16, %s21_s21  }
   0x7   : > { %p30_p4 = por %p29_p2, %p28_p1  ;;  %p1881_p5 = por %p121_p3, %p28_p1 }
   0x8   : > { %p1682_p6 = scmp.ge.s32.totalorder %s1814_s17, 2 }
   0xa   : > { %152 = sbr.rel (%p1682_p6) target bundleno = 27 (0x1b), region = 28 }
   0xf   : > { %155 = sbr.rel (!%p30_p4) target bundleno = 27 (0x1b), region = 32  ;;  %s157_s24 = sand.u32 (%p30_p4), 1, %s1810_s16  }
  0x10   : > { %s1714_s25 = sshll.u32 (%p30_p4), %s1814_s17, 4  ;;  %s1683_s26 = sshll.u32 (%p30_p4), %s157_s24, 6 }
  0x11   : > { %s162_s29 = scalar_lea.vmem (%p30_p4), %s2558_s0, %s1714_s25  ;;  %s159_s30 = scalar_lea.vmem (%p30_p4), [#allocation3], %s1683_s26 }
  0x12   : > { %v205_v0 = vld [vmem:[%s162_s29] sm:$0xff] (%p30_p4)  ;;  %v207_v1 = vld [vmem:[%s162_s29 + $0x8] sm:$0xff] (%p30_p4) }
  0x13   : > { %v209_v2 = vld [vmem:[%s162_s29 + $0x20] sm:$0xff] (%p30_p4)  ;;  %206 = vst [vmem:[%s159_s30] sm:$0xff] (%p30_p4), %v205_v0  ;;  %v211_v3 = vld [vmem:[%s162_s29 + $0x28] sm:$0xff] (%p30_p4) }
  0x14   : > { %208 = vst [vmem:[%s159_s30 + $0x8] sm:$0xff] %v207_v1  ;;  %v213_v4 = vld [vmem:[%s162_s29 + $0x40] sm:$0xff]  ;;  %v215_v5 = vld [vmem:[%s162_s29 + $0x48] sm:$0xff] }
  0x15   : > { %210 = vst [vmem:[%s159_s30 + $0x10] sm:$0xff] %v209_v2  ;;  %v217_v6 = vld [vmem:[%s162_s29 + $0x60] sm:$0xff]  ;;  %v219_v7 = vld [vmem:[%s162_s29 + $0x68] sm:$0xff] }
  0x16   : > { %212 = vst [vmem:[%s159_s30 + $0x18] sm:$0xff] %v211_v3 }
  0x17   : > { %214 = vst [vmem:[%s159_s30 + $0x20] sm:$0xff] %v213_v4 }
  0x18   : > { %216 = vst [vmem:[%s159_s30 + $0x28] sm:$0xff] %v215_v5 }
  0x19   : > { %218 = vst [vmem:[%s159_s30 + $0x30] sm:$0xff] %v217_v6 }
  0x1a   : > { %220 = vst [vmem:[%s159_s30 + $0x38] sm:$0xff] %v219_v7 }
  0x1b PF: > { %p1686_p7 = scmp.ge.s32.totalorder %s1814_s17, 1  ;;  %p225_p8 = scmp.lt.s32.totalorder %s1814_s17, 3 }
  0x1d   : > { %p226_p9 = pnand %p1686_p7, %p225_p8 }
  0x1e   : > { %s232_s9 = sand.u32 (!%p226_p9), 1, %s1806_s15   ;;  %s1818_s12 = smov (!%p226_p9), 80  }
  0x1f   : > { %229 = sbr.rel (%p226_p9) target bundleno = 856 (0x358), region = 70  ;;  %s1687_s10 = sshll.u32 (!%p226_p9), %s232_s9, 6 }
  0x20   : > { %s234_s11 = scalar_lea.vmem (!%p226_p9), [#allocation3], %s1687_s10  ;;  %s1819_s13 = smov (!%p226_p9), 16  }
  0x21   : > { %s1820_s14 = smov (!%p226_p9), 64   ;;  %s1821_s20 = smov (!%p226_p9), 48  }
  0x22   : > { %s1822_s21 = smov (!%p226_p9), 32   ;;  %s1824_s24 = smov (!%p226_p9), 96  }
  0x23   : > { %s1825_s27 = smov (!%p226_p9), 112   ;;  %s1688_s30 = sshll.u32 (!%p226_p9), %s232_s9, 7 }
  0x24   : > { %v267_v8 = vld [vmem:[%s2559_s1 + $0x8] sm:$0xff]  ;;  %v266_v9 = vld [vmem:[%s2559_s1] sm:$0xff]  ;;  %vm268_vm0 = vcmask 130048   ;;  %v1903_v13 = vld [vmem:[%s234_s11 + $0x30] sm:$0xff]  ;;  %v1816_v29 = vmov 1983009808  }
  0x25   : > { %323 = vmatpush.msra.mxu0 %v267_v8  ;;  %1716 = vmatpush.msra.mxu2 %v267_v8  ;;  %v258_v10 = vld [vmem:[%s234_s11] sm:$0xff]  ;;  %v263_v11 = vld [vmem:[%s234_s11 + $0x28] sm:$0xff]  ;;  %v260_v14 = vld [vmem:[%s234_s11 + $0x10] sm:$0xff]  ;;  %275 = vst.msk [vmem:[#allocation2 + $0x30] sm:$0xff] %vm268_vm0, %v1903_v13  ;;  %v561_v30 = vunpack.c.l.s4 %v1816_v29  ;;  %vm556_vm1 = vcmask 1047556   ;;  %vm1006_vm2 = vcmask 261120  }
  0x26   : > { %429 = vmatpush.msra.mxu1 %v267_v8  ;;  %1718 = vmatpush.msra.mxu3 %v267_v8  ;;  %v259_v12 = vld [vmem:[%s234_s11 + $0x8] sm:$0xff]  ;;  %269 = vst.msk [vmem:[#allocation2] sm:$0xff] %vm268_vm0, %v258_v10  ;;  %v1907_v15 = vld [vmem:[%s234_s11 + $0x38] sm:$0xff]  ;;  %v1914_v17 = vld [vmem:[%s234_s11 + $0x20] sm:$0xff]  ;;  %v1951_v26 = vmul.f32 0.05, %v258_v10 }
  0x27   : > { %324 = vmatpush.msra.mxu0 %v266_v9  ;;  %1717 = vmatpush.msra.mxu2 %v266_v9  ;;  %274 = vst.msk [vmem:[#allocation2 + $0x28] sm:$0xff] %vm268_vm0, %v263_v11  ;;  %v1911_v16 = vld [vmem:[%s234_s11 + $0x18] sm:$0xff]  ;;  %v1958_v35 = vunpack.c.0.s8 %v561_v30  ;;  %v1960_v36 = vmul.f32 0.05, %v263_v11  ;;  %v1962_v38 = vmul.f32 0.05, %v259_v12 }
  0x28   : > { %430 = vmatpush.msra.mxu1 %v266_v9  ;;  %1719 = vmatpush.msra.mxu3 %v266_v9  ;;  %270 = vst.msk [vmem:[#allocation2 + $0x8] sm:$0xff] %vm268_vm0, %v259_v12  ;;  %v1991_v54 = vmul.f32 0.05, %v1903_v13  ;;  %v1993_v56 = vmul.f32 0.05, %v260_v14  ;;  %vm1009_vm3 = vcmask 392192  }
  0x29   : > { %271 = vst.msk [vmem:[#allocation2 + $0x10] sm:$0xff] %vm268_vm0, %v260_v14  ;;  %v2015_v5 = vmul.f32 0.05, %v1907_v15  ;;  %v2018_v7 = vmul.f32 0.05, %v1911_v16  ;;  %vm1012_vm4 = vcmask 523264  }
  0x2a   : > { %276 = vst.msk [vmem:[#allocation2 + $0x38] sm:$0xff] %vm268_vm0, %v1907_v15  ;;  %v2038_v29 = vmul.f32 0.05, %v1914_v17  ;;  %vm1015_vm5 = vcmask 654336   ;;  %vm1018_vm6 = vcmask 785408   ;;  %vm1189_vm7 = vcmask 1043456  }
  0x2b   : > { %272 = vst.msk [vmem:[#allocation2 + $0x18] sm:$0xff] %vm268_vm0, %v1911_v16  ;;  %vm1021_vm8 = vcmask 916480   ;;  %vm1185_vm9 = vcmask 97280   ;;  %s2454_s15 = scalar_lea.vmem [#allocation4], %s1688_s30  ;;  %s1715_s5 = sshll.u32 (%p1881_p5), %s1679_s18, 4 }
  0x2c   : > { %273 = vst.msk [vmem:[#allocation2 + $0x20] sm:$0xff] %vm268_vm0, %v1914_v17  ;;  %v1932_v21 = vld [vmem:[#allocation2 + $0x30] sm:$0xff]  ;;  %s1529_s23 = scalar_lea.vmem (%p1881_p5), %s2562_s4, %s1715_s5 }
  0x2d   : > { %v1920_v18 = vld [vmem:[#allocation2] sm:$0xff]  ;;  %v568_v14 = vrot.slane %v1932_v21, 4 }
  0x2e   : > { %1689 = vmatmul.msk.f32.vlgmr.msra.gmra.mxu0 %vm268_vm0, %v1920_v18  ;;  %v1926_v19 = vld [vmem:[#allocation2 + $0x28] sm:$0xff]  ;;  %v558_v46 = vrot.slane %v1920_v18, 4 }
  0x2f   : > { %1694 = vmatmul.msk.f32.vlgmr.msra.gmra.mxu2 %vm268_vm0, %v1926_v19  ;;  %v1930_v20 = vld [vmem:[#allocation2 + $0x8] sm:$0xff]  ;;  %v724_v12 = vrot.slane %v1926_v19, 4 }
  0x30   : > { %v1938_v22 = vld [vmem:[#allocation2 + $0x10] sm:$0xff]  ;;  %v726_v31 = vrot.slane %v1930_v20, 4 }
  0x31   : > { %v1940_v23 = vld [vmem:[#allocation2 + $0x38] sm:$0xff]  ;;  %v570_v44 = vrot.slane %v1938_v22, 4 }
  0x32   : > { %v280_v24 = vld [vmem:[#allocation2 + $0x18] sm:$0xff]  ;;  %v727_v33 = vsel %vm556_vm1, %v1926_v19, %v726_v31  ;;  %v736_v4 = vrot.slane %v1940_v23, 4 }
  0x33   : > { %v1947_v25 = vld [vmem:[#allocation2 + $0x20] sm:$0xff]  ;;  %v738_v34 = vrot.slane %v280_v24, 4  ;;  %v1965_v39 = vperm.slane %v727_v33, %v1958_v35  ;;  %v571_v53 = vsel %vm556_vm1, %v1932_v21, %v570_v44  ;;  %v1817_v33 = vmov 1934713408  }
  0x34   : > { %v559_v51 = vsel %vm556_vm1, %v1947_v25, %v558_v46  ;;  %v2000_v60 = vperm.slane %v571_v53, %v1958_v35  ;;  %v737_v10 = vsel %vm556_vm1, %v736_v4, %v280_v24 }
  0x35   : > { %v739_v42 = vsel %vm556_vm1, %v1940_v23, %v738_v34  ;;  %v786_v49 = vrot.slane %v1965_v39, 4  ;;  %v1986_v52 = vperm.slane %v559_v51, %v1958_v35  ;;  %v2026_v15 = vperm.slane %v737_v10, %v1958_v35 }
  0x36   : > { %1690 = vmatmul.msk.f32.gmra.mxu0 %vm268_vm0, %v1930_v20  ;;  %v1974_v48 = vperm.slane %v739_v42, %v1958_v35  ;;  %v609_v34 = vunpack.c.l.s4 %v1817_v33 }
  0x37   : > { %1695 = vmatmul.msk.f32.gmra.mxu2 %vm268_vm0, %v1932_v21  ;;  %v618_v61 = vrot.slane %v1986_v52, 4  ;;  %v555_v21 = vrot.slane %v1947_v25, 4  ;;  %v772_v31 = vrot.slane %v2026_v15, 4 }
  0x38   : > { %v1997_v57 = vsel %vm556_vm1, %v1974_v48, %v786_v49  ;;  %v784_v30 = vrot.slane %v1974_v48, 4  ;;  %v2058_v49 = vunpack.c.0.s8 %v609_v34 }
  0x39   : > { %v2006_v0 = vsel %vm556_vm1, %v2000_v60, %v618_v61 }
  0x3e   : > { %1691 = vmatmul.msk.f32.gmra.mxu0 %vm268_vm0, %v1938_v22 }
  0x3f   : > { %1696 = vmatmul.msk.f32.gmra.mxu2 %vm268_vm0, %v1940_v23 }
  0x46   : > { %1692 = vmatmul.msk.f32.gmra.mxu0 %vm268_vm0, %v280_v24  ;;  %v725_v24 = vsel %vm556_vm1, %v724_v12, %v1930_v20  ;;  %v616_v20 = vrot.slane %v2000_v60, 4  ;;  %v795_v12 = vperm.slane %v1997_v57, %v2058_v49 }
  0x4e   : > { %1693 = vmatmul.msk.f32.gmra.mxu0 %vm268_vm0, %v1947_v25 }
  0xab   : > { %v326_v27 = vpop.f32.mrf.mxu0 }
  0xac   : > { %v358_v28 = vmul.f32 0.95, %v326_v27 }
  0xae   : > { %v366_v32 = vadd.f32 %v358_v28, %v1951_v26  ;;  %v569_v28 = vsel %vm556_vm1, %v568_v14, %v1938_v22 }
  0xaf   : > { %v2048_v22 = vperm.slane %v569_v28, %v1958_v35 }
  0xb0   : > { %375 = vst.msk [vmem:[#allocation2 + $0x40] sm:$0xff] %vm268_vm0, %v366_v32 }
  0xb2   : > { %v341_v37 = vpop.f32.mrf.mxu2 }
  0xb3   : > { %v363_v40 = vmul.f32 0.95, %v341_v37  ;;  %v329_v41 = vpop.f32.mrf.mxu0  ;;  %v2043_v37 = vperm.slane %v725_v24, %v1958_v35 }
  0xb4   : > { %v359_v43 = vmul.f32 0.95, %v329_v41  ;;  %v557_v41 = vsel %vm556_vm1, %v555_v21, %v1920_v18  ;;  %v617_v18 = vsel %vm556_vm1, %v616_v20, %v1986_v52  ;;  %v834_v20 = vrot.slane %v795_v12, 4 }
  0xb5   : > { %v371_v45 = vadd.f32 %v363_v40, %v1960_v36  ;;  %v773_v46 = vsel %vm556_vm1, %v772_v31, %v2043_v37  ;;  %v2082_v4 = vperm.slane %v617_v18, %v2058_v49 }
  0xb6   : > { %v367_v47 = vadd.f32 %v359_v43, %v1962_v38 }
  0xb7   : > { %380 = vst.msk [vmem:[#allocation2 + $0x68] sm:$0xff] %vm268_vm0, %v371_v45  ;;  %v1978_v50 = vld [vmem:[#allocation2 + $0x40] sm:$0xff]  ;;  %v785_v45 = vsel %vm556_vm1, %v784_v30, %v1965_v39  ;;  %v662_v30 = vrot.slane %v2082_v4, 4 }
  0xb8   : > { %376 = vst.msk [vmem:[#allocation2 + $0x48] sm:$0xff] %vm268_vm0, %v367_v47  ;;  %1697 = vmatmul.msk.f32.vlgmr.msra.gmra.mxu1 %vm268_vm0, %v1978_v50 }
  0xba   : > { %v344_v55 = vpop.f32.mrf.mxu2 }
  0xbb   : > { %v364_v58 = vmul.f32 0.95, %v344_v55  ;;  %v332_v59 = vpop.f32.mrf.mxu0  ;;  %v2066_v55 = vperm.slane %v557_v41, %v1958_v35 }
  0xbc   : > { %v360_v62 = vmul.f32 0.95, %v332_v59  ;;  %v2070_v59 = vperm.slane %v785_v45, %v2058_v49 }
  0xbd   : > { %v372_v63 = vadd.f32 %v364_v58, %v1991_v54  ;;  %v604_v58 = vrot.slane %v2048_v22, 4 }
  0xbe   : > { %v368_v1 = vadd.f32 %v360_v62, %v1993_v56  ;;  %v388_v2 = vld [vmem:[#allocation2 + $0x68] sm:$0xff]  ;;  %v779_v62 = vperm.slane %v773_v46, %v2058_v49 }
  0xbf   : > { %381 = vst.msk [vmem:[#allocation2 + $0x70] sm:$0xff] %vm268_vm0, %v372_v63  ;;  %1702 = vmatmul.msk.f32.vlgmr.msra.gmra.mxu3 %vm268_vm0, %v388_v2  ;;  %v384_v3 = vld [vmem:[#allocation2 + $0x48] sm:$0xff]  ;;  %v748_v17 = vrot.slane %v388_v2, 4  ;;  %v582_v63 = vrot.slane %v1978_v50, 4 }
  0xc0   : > { %377 = vst.msk [vmem:[#allocation2 + $0x50] sm:$0xff] %vm268_vm0, %v368_v1  ;;  %1698 = vmatmul.msk.f32.gmra.mxu1 %vm268_vm0, %v384_v3  ;;  %v750_v19 = vrot.slane %v384_v3, 4 }
  0xc1   : > { %v749_v60 = vsel %vm556_vm1, %v748_v17, %v384_v3 }
  0xc2   : > { %v347_v6 = vpop.f32.mrf.mxu2  ;;  %v751_v25 = vsel %vm556_vm1, %v388_v2, %v750_v19  ;;  %v2089_v10 = vperm.slane %v749_v60, %v1958_v35  ;;  %v606_v19 = vrot.slane %v2066_v55, 4 }
  0xc3   : > { %v365_v8 = vmul.f32 0.95, %v347_v6  ;;  %v335_v9 = vpop.f32.mrf.mxu0  ;;  %v759_v51 = vperm.slane %v751_v25, %v1958_v35 }
  0xc4   : > { %v361_v11 = vmul.f32 0.95, %v335_v9  ;;  %v605_v9 = vsel %vm556_vm1, %v604_v58, %v2066_v55 }
  0xc5   : > { %v373_v13 = vadd.f32 %v365_v8, %v2015_v5  ;;  %v810_v8 = vrot.slane %v759_v51, 4  ;;  %v611_v31 = vperm.slane %v605_v9, %v2058_v49 }
  0xc6   : > { %v369_v23 = vadd.f32 %v361_v11, %v2018_v7  ;;  %v389_v27 = vld [vmem:[#allocation2 + $0x70] sm:$0xff] }
  0xc7   : > { %382 = vst.msk [vmem:[#allocation2 + $0x78] sm:$0xff] %vm268_vm0, %v373_v13  ;;  %1703 = vmatmul.msk.f32.gmra.mxu3 %vm268_vm0, %v389_v27  ;;  %v385_v16 = vld [vmem:[#allocation2 + $0x50] sm:$0xff]  ;;  %v592_v48 = vrot.slane %v389_v27, 4 }
  0xc8   : > { %378 = vst.msk [vmem:[#allocation2 + $0x58] sm:$0xff] %vm268_vm0, %v369_v23  ;;  %1699 = vmatmul.msk.f32.gmra.mxu1 %vm268_vm0, %v385_v16  ;;  %v594_v44 = vrot.slane %v385_v16, 4  ;;  %v830_v23 = vrot.slane %v2070_v59, 4 }
  0xc9   : > { %v593_v3 = vsel %vm556_vm1, %v592_v48, %v385_v16 }
  0xca   : > { %v595_v1 = vsel %vm556_vm1, %v389_v27, %v594_v44  ;;  %v599_v16 = vperm.slane %v593_v3, %v1958_v35 }
  0xcb   : > { %v338_v32 = vpop.f32.mrf.mxu0  ;;  %v603_v13 = vperm.slane %v595_v1, %v1958_v35 }
  0xcc   : > { %v362_v40 = vmul.f32 0.95, %v338_v32  ;;  %v628_v45 = vrot.slane %v599_v16, 4 }
  0xcd   : > { %v640_v17 = vrot.slane %v603_v13, 4 }
  0xce   : > { %v370_v42 = vadd.f32 %v362_v40, %v2038_v29  ;;  %v390_v43 = vld [vmem:[#allocation2 + $0x78] sm:$0xff] }
  0xcf   : > { %1704 = vmatmul.msk.f32.gmra.mxu3 %vm268_vm0, %v390_v43  ;;  %v386_v47 = vld [vmem:[#allocation2 + $0x58] sm:$0xff]  ;;  %v760_v53 = vrot.slane %v390_v43, 4 }
  0xd0   : > { %379 = vst.msk [vmem:[#allocation2 + $0x60] sm:$0xff] %vm268_vm0, %v370_v42  ;;  %1700 = vmatmul.msk.f32.gmra.mxu1 %vm268_vm0, %v386_v47  ;;  %v762_v39 = vrot.slane %v386_v47, 4  ;;  %v627_v42 = vperm.slane %v2006_v0, %v2058_v49  ;;  %v654_v0 = vrot.slane %v611_v31, 4 }
  0xd1   : > { %v761_v61 = vsel %vm556_vm1, %v760_v53, %v386_v47 }
  0xd2   : > { %v763_v52 = vsel %vm556_vm1, %v390_v43, %v762_v39  ;;  %v2079_v2 = vperm.slane %v761_v61, %v1958_v35  ;;  %v822_v39 = vrot.slane %v779_v62, 4  ;;  %v666_v60 = vrot.slane %v627_v42, 4 }
  0xd3   : > { %v771_v6 = vperm.slane %v763_v52, %v1958_v35 }
  0xd4   : > { %v796_v11 = vrot.slane %v2079_v2, 4 }
  0xd5   : > { %v808_v14 = vrot.slane %v771_v6, 4  ;;  %v811_v27 = vsel %vm556_vm1, %v771_v6, %v810_v8  ;;  %v774_v8 = vrot.slane %v2043_v37, 4 }
  0xd6   : > { %v797_v24 = vsel %vm556_vm1, %v796_v11, %v2089_v10  ;;  %v819_v21 = vperm.slane %v811_v27, %v2058_v49 }
  0xd7   : > { %v387_v28 = vld [vmem:[#allocation2 + $0x60] sm:$0xff]  ;;  %v809_v57 = vsel %vm556_vm1, %v808_v14, %v759_v51  ;;  %v803_v32 = vperm.slane %v797_v24, %v2058_v49 }
  0xd8   : > { %1701 = vmatmul.msk.f32.gmra.mxu1 %vm268_vm0, %v387_v28  ;;  %v583_v33 = vsel %vm556_vm1, %v387_v28, %v582_v63  ;;  %v580_v34 = vrot.slane %v387_v28, 4  ;;  %v832_v40 = vrot.slane %v819_v21, 4  ;;  %v815_v43 = vperm.slane %v809_v57, %v2058_v49 }
  0xd9   : > { %v591_v25 = vperm.slane %v583_v33, %v1958_v35  ;;  %v820_v41 = vrot.slane %v803_v32, 4  ;;  %v2124_v55 = vsel %vm556_vm1, %v819_v21, %v834_v20  ;;  %v823_v11 = vsel %vm556_vm1, %v803_v32, %v822_v39 }
  0xda   : > { %v581_v44 = vsel %vm556_vm1, %v580_v34, %v1978_v50  ;;  %v2115_v46 = vsel %vm556_vm1, %v832_v40, %v795_v12  ;;  %v831_v63 = vsel %vm556_vm1, %v815_v43, %v830_v23  ;;  %v828_v24 = vrot.slane %v815_v43, 4 }
  0xdb   : > { %v641_v47 = vsel %vm556_vm1, %v640_v17, %v591_v25  ;;  %v642_v48 = vrot.slane %v591_v25, 4  ;;  %v587_v51 = vperm.slane %v581_v44, %v1958_v35  ;;  %v2120_v53 = vsel %vm556_vm1, %v820_v41, %v779_v62 }
  0xdc   : > { %v647_v18 = vperm.slane %v641_v47, %v2058_v49  ;;  %v607_v62 = vsel %vm556_vm1, %v2048_v22, %v606_v19  ;;  %v775_v19 = vsel %vm556_vm1, %v2026_v15, %v774_v8  ;;  %v829_v33 = vsel %vm556_vm1, %v828_v24, %v2070_v59 }
  0xdd   : > { %v629_v50 = vsel %vm556_vm1, %v628_v45, %v587_v51  ;;  %v643_v58 = vsel %vm556_vm1, %v603_v13, %v642_v48  ;;  %v630_v13 = vrot.slane %v587_v51, 4  ;;  %v783_v15 = vperm.slane %v775_v19, %v2058_v49 }
  0xde   : > { %v663_v61 = vsel %vm556_vm1, %v647_v18, %v662_v30  ;;  %v635_v1 = vperm.slane %v629_v50, %v2058_v49  ;;  %v651_v52 = vperm.slane %v643_v58, %v2058_v49  ;;  %v660_v3 = vrot.slane %v647_v18, 4 }
  0xdf   : > { %v1754_v6 = vpack.i.bf16 %v831_v63, %v663_v61  ;;  %v615_v30 = vperm.slane %v607_v62, %v2058_v49  ;;  %v631_v32 = vsel %vm556_vm1, %v599_v16, %v630_v13 }
  0xe0   : > { %v655_v9 = vsel %vm556_vm1, %v635_v1, %v654_v0  ;;  %v652_v12 = vrot.slane %v635_v1, 4  ;;  %v664_v23 = vrot.slane %v651_v52, 4  ;;  %v2139_v27 = vsel %vm556_vm1, %v651_v52, %v666_v60 }
  0xe1   : > { %1755 = vrot.lane.b32.xlu1 %v1754_v6, %s1818_s12  ;;  %v1759_v14 = vpack.i.bf16 %v823_v11, %v655_v9  ;;  %v1784_v22 = vpack.i.bf16 %v2124_v55, %v2139_v27  ;;  %v661_v28 = vsel %vm556_vm1, %v660_v3, %v2082_v4  ;;  %v639_v4 = vperm.slane %v631_v32, %v2058_v49 }
  0xe2   : > { %v2142_v37 = vsel %vm556_vm1, %v652_v12, %v611_v31  ;;  %v2150_v21 = vsel %vm556_vm1, %v664_v23, %v627_v42  ;;  %v798_v31 = vrot.slane %v2089_v10, 4  ;;  %v1764_v34 = vpack.i.bf16 %v829_v33, %v661_v28 }
  0xe3   : > { %1760 = vrot.lane.b32.xlu2 %v1759_v14, %s1819_s13  ;;  %v1779_v57 = vpack.i.bf16 %v2115_v46, %v2150_v21  ;;  %v658_v20 = vrot.slane %v615_v30, 4  ;;  %v826_v10 = vrot.slane %v783_v15, 4  ;;  %v656_v41 = vrot.slane %v639_v4, 4 }
  0xe4   : > { %v799_v40 = vsel %vm556_vm1, %v2079_v2, %v798_v31 }
  0xe5   : > { %v807_v25 = vperm.slane %v799_v40, %v2058_v49  ;;  %v659_v16 = vsel %vm556_vm1, %v639_v4, %v658_v20  ;;  %v657_v2 = vsel %vm556_vm1, %v656_v41, %v615_v30  ;;  %v1823_v41 = vmov 0  }
  0xe6   : > { %1790 = vset.pattern.permute.xlu1 %v1823_v41  ;;  %1791 = vset.pattern.permute.xlu2 %v1823_v41 }
  0xe7   : > { %v827_v17 = vsel %vm556_vm1, %v807_v25, %v826_v10  ;;  %v824_v42 = vrot.slane %v807_v25, 4  ;;  %1789 = vset.pattern.permute.xlu0 %v1823_v41 }
  0xe8   : > { %v1769_v59 = vpack.i.bf16 %v827_v17, %v659_v16 }
  0xe9   : > { %1765 = vrot.lane.b32.xlu1 %v1764_v34, %s1820_s14  ;;  %v825_v43 = vsel %vm556_vm1, %v824_v42, %v783_v15 }
  0xea   : > { %v1774_v44 = vpack.i.bf16 %v825_v43, %v657_v2 }
  0xf1   : > { %1770 = vrot.lane.b32.xlu1 %v1769_v59, %s1821_s20 }
  0xf9   : > { %1775 = vrot.lane.b32.xlu1 %v1774_v44, %s1822_s21 }
 0x135   : > { %v432_v45 = vpop.f32.mrf.mxu1 }
 0x136   : > { %v456_v47 = vmul.f32 0.95, %v432_v45 }
 0x138   : > { %v464_v48 = vadd.f32 %v456_v47, %v1951_v26 }
 0x13a   : > { %473 = vst.msk [vmem:[#allocation2 + $0x80] sm:$0xff] %vm268_vm0, %v464_v48 }
 0x13d   : > { %v435_v51 = vpop.f32.mrf.mxu1  ;;  %v1761_v27 = vpop.permute.xlu2 %1760 }
 0x13e   : > { %v457_v18 = vmul.f32 0.95, %v435_v51 }
 0x140   : > { %v465_v0 = vadd.f32 %v457_v18, %v1962_v38 }
 0x141   : > { %v498_v15 = vld [vmem:[#allocation2 + $0x80] sm:$0xff] }
 0x142   : > { %474 = vst.msk [vmem:[#allocation2 + $0x88] sm:$0xff] %vm268_vm0, %v465_v0  ;;  %v447_v39 = vpop.f32.mrf.mxu3  ;;  %v670_v10 = vrot.slane %v498_v15, 4 }
 0x143   : > { %v461_v50 = vmul.f32 0.95, %v447_v39 }
 0x145   : > { %v469_v58 = vadd.f32 %v461_v50, %v1960_v36  ;;  %v438_v60 = vpop.f32.mrf.mxu1 }
 0x146   : > { %v458_v61 = vmul.f32 0.95, %v438_v60 }
 0x147   : > { %478 = vst.msk [vmem:[#allocation2 + $0xa8] sm:$0xff] %vm268_vm0, %v469_v58 }
 0x148   : > { %v466_v63 = vadd.f32 %v458_v61, %v1993_v56 }
 0x149   : > { %v499_v62 = vld [vmem:[#allocation2 + $0x88] sm:$0xff] }
 0x14a   : > { %475 = vst.msk [vmem:[#allocation2 + $0x90] sm:$0xff] %vm268_vm0, %v466_v63  ;;  %v450_v26 = vpop.f32.mrf.mxu3  ;;  %v838_v12 = vrot.slane %v499_v62, 4 }
 0x14b   : > { %v462_v1 = vmul.f32 0.95, %v450_v26 }
 0x14d   : > { %v470_v52 = vadd.f32 %v462_v1, %v1991_v54  ;;  %v441_v6 = vpop.f32.mrf.mxu1 }
 0x14e   : > { %v459_v38 = vmul.f32 0.95, %v441_v6  ;;  %v503_v9 = vld [vmem:[#allocation2 + $0xa8] sm:$0xff] }
 0x14f   : > { %479 = vst.msk [vmem:[#allocation2 + $0xb0] sm:$0xff] %vm268_vm0, %v470_v52  ;;  %v836_v23 = vrot.slane %v503_v9, 4 }
 0x150   : > { %v467_v8 = vadd.f32 %v459_v38, %v2018_v7  ;;  %v839_v7 = vsel %vm556_vm1, %v503_v9, %v838_v12  ;;  %v506_v12 = vld [vmem:[%s2561_s3] sm:$0xff] }
 0x151   : > { %v500_v13 = vld [vmem:[#allocation2 + $0x90] sm:$0xff]  ;;  %v837_v30 = vsel %vm556_vm1, %v836_v23, %v499_v62  ;;  %v513_v23 = vrot.slane %v506_v12, 6  ;;  %v509_v21 = vrot.slane %v506_v12, 2  ;;  %v510_v41 = vrot.slane %v506_v12, 3 }
 0x152   : > { %476 = vst.msk [vmem:[#allocation2 + $0x98] sm:$0xff] %vm268_vm0, %v467_v8  ;;  %v453_v36 = vpop.f32.mrf.mxu3  ;;  %v682_v24 = vrot.slane %v500_v13, 4  ;;  %v843_v33 = vperm.slane %v837_v30, %v1958_v35 }
 0x153   : > { %v463_v3 = vmul.f32 0.95, %v453_v36  ;;  %v2264_v55 = vpop.permute.xlu1 %1755 }
 0x154   : > { %v862_v17 = vrot.slane %v843_v33, 4 }
 0x155   : > { %v471_v56 = vadd.f32 %v463_v3, %v2015_v5  ;;  %v444_v11 = vpop.f32.mrf.mxu1  ;;  %v847_v5 = vperm.slane %v839_v7, %v1958_v35  ;;  %v521_v7 = vperm.slane %v513_v23, 0 }
 0x156   : > { %v460_v14 = vmul.f32 0.95, %v444_v11  ;;  %v504_v28 = vld [vmem:[#allocation2 + $0xb0] sm:$0xff] }
 0x157   : > { %480 = vst.msk [vmem:[#allocation2 + $0xb8] sm:$0xff] %vm268_vm0, %v471_v56  ;;  %v683_v32 = vsel %vm556_vm1, %v504_v28, %v682_v24  ;;  %v874_v25 = vrot.slane %v847_v5, 4  ;;  %v680_v44 = vrot.slane %v504_v28, 4 }
 0x158   : > { %v468_v54 = vadd.f32 %v460_v14, %v2038_v29  ;;  %v691_v4 = vperm.slane %v683_v32, %v1958_v35 }
 0x159   : > { %v501_v19 = vld [vmem:[#allocation2 + $0x98] sm:$0xff]  ;;  %v681_v61 = vsel %vm556_vm1, %v680_v44, %v500_v13  ;;  %v511_v44 = vrot.slane %v506_v12, 4 }
 0x15a   : > { %477 = vst.msk [vmem:[#allocation2 + $0xa0] sm:$0xff] %vm268_vm0, %v468_v54  ;;  %v850_v31 = vrot.slane %v501_v19, 4  ;;  %v704_v48 = vrot.slane %v691_v4, 4  ;;  %v687_v52 = vperm.slane %v681_v61, %v1958_v35 }
 0x15e   : > { %v505_v34 = vld [vmem:[#allocation2 + $0xb8] sm:$0xff] }
 0x15f   : > { %v848_v40 = vrot.slane %v505_v34, 4  ;;  %v851_v29 = vsel %vm556_vm1, %v505_v34, %v850_v31 }
 0x160   : > { %v859_v20 = vperm.slane %v851_v29, %v1958_v35  ;;  %v512_v29 = vrot.slane %v506_v12, 5 }
 0x161   : > { %v849_v16 = vsel %vm556_vm1, %v848_v40, %v501_v19  ;;  %v502_v59 = vld [vmem:[#allocation2 + $0xa0] sm:$0xff] }
 0x162   : > { %v875_v42 = vsel %vm556_vm1, %v859_v20, %v874_v25  ;;  %v855_v2 = vperm.slane %v849_v16, %v1958_v35  ;;  %v671_v43 = vsel %vm556_vm1, %v502_v59, %v670_v10  ;;  %v668_v51 = vrot.slane %v502_v59, 4 }
 0x163   : > { %v2202_v45 = vperm.slane %v875_v42, %v2058_v49  ;;  %v679_v47 = vperm.slane %v671_v43, %v1958_v35  ;;  %v872_v18 = vrot.slane %v859_v20, 4  ;;  %v520_v20 = vperm.slane %v512_v29, 0 }
 0x164   : > { %v863_v0 = vsel %vm556_vm1, %v855_v2, %v862_v17  ;;  %v669_v60 = vsel %vm556_vm1, %v668_v51, %v498_v15  ;;  %v860_v13 = vrot.slane %v855_v2, 4  ;;  %v508_v16 = vrot.slane %v506_v12, 1 }
 0x165   : > { %992 = vrot.lane.b32.xlu0 %v2202_v45, %s1824_s24  ;;  %v871_v39 = vperm.slane %v863_v0, %v2058_v49  ;;  %v705_v50 = vsel %vm556_vm1, %v704_v48, %v679_v47  ;;  %v675_v63 = vperm.slane %v669_v60, %v1958_v35  ;;  %v706_v26 = vrot.slane %v679_v47, 4 }
 0x166   : > { %v711_v58 = vperm.slane %v705_v50, %v2058_v49  ;;  %v873_v1 = vsel %vm556_vm1, %v872_v18, %v847_v5  ;;  %v861_v24 = vsel %vm556_vm1, %v860_v13, %v843_v33  ;;  %v517_v33 = vperm.slane %v509_v21, 0 }
 0x167   : > { %960 = vrot.lane.b32.xlu1 %v871_v39, %s1822_s21  ;;  %v694_v6 = vrot.slane %v675_v63, 4  ;;  %v879_v38 = vperm.slane %v873_v1, %v2058_v49  ;;  %v707_v36 = vsel %vm556_vm1, %v691_v4, %v706_v26  ;;  %v886_v9 = vrot.slane %v871_v39, 4 }
 0x168   : > { %920 = vrot.lane.b32.xlu2 %v711_v58, %s1820_s14  ;;  %v715_v3 = vperm.slane %v707_v36, %v2058_v49  ;;  %v720_v56 = vrot.slane %v711_v58, 4  ;;  %v2240_v30 = vperm.slane %v861_v24, %v2058_v49  ;;  %v890_v10 = vrot.slane %v2202_v45, 4 }
 0x169   : > { %v695_v8 = vsel %vm556_vm1, %v687_v52, %v694_v6  ;;  %v887_v11 = vsel %vm556_vm1, 0.0, %v886_v9  ;;  %v888_v54 = vrot.slane %v879_v38, 4  ;;  %v516_v59 = vperm.slane %v508_v16, 0 }
 0x16a   : > { %v703_v62 = vperm.slane %v695_v8, %v2058_v49  ;;  %v721_v14 = vsel %vm556_vm1, 0.0, %v720_v56  ;;  %v722_v19 = vrot.slane %v715_v3, 4  ;;  %v884_v31 = vrot.slane %v2240_v30, 4 }
 0x16b   : > { %v889_v28 = vsel %vm556_vm1, 0.0, %v888_v54  ;;  %v891_v17 = vsel %vm556_vm1, 0.0, %v890_v10  ;;  %v514_v42 = vrot.slane %v506_v12, 7  ;;  %v518_v2 = vperm.slane %v510_v41, 0 }
 0x16c   : > { %v723_v46 = vsel %vm556_vm1, 0.0, %v722_v19  ;;  %v718_v32 = vrot.slane %v703_v62, 4  ;;  %v885_v15 = vsel %vm556_vm1, 0.0, %v884_v31  ;;  %v519_v45 = vperm.slane %v511_v44, 0 }
 0x16d   : > { %976 = vrot.lane.b32.xlu0 %v879_v38, %s1820_s14  ;;  %v522_v43 = vperm.slane %v514_v42, 0  ;;  %v515_v47 = vperm.slane %v506_v12, 0  ;;  %v1762_v8 = vunpack.i.l.bf16 %v1761_v27 }
 0x16e   : > { %v719_v40 = vsel %vm556_vm1, 0.0, %v718_v32 }
 0x16f   : > { %904 = vrot.lane.b32.xlu1 %v703_v62, %s1822_s21 }
 0x170   : > { %936 = vrot.lane.b32.xlu2 %v715_v3, %s1824_s24  ;;  %v1763_v3 = vunpack.i.h.bf16 %v1761_v27 }
 0x172   : > { %v1024_v24 = vsel %vm268_vm0, %v2120_v53, %v1763_v3 }
 0x175   : > { %968 = vrot.lane.b32.xlu0 %v887_v11, %s1821_s20  ;;  %v1004_v11 = vsel %vm268_vm0, %v2142_v37, %v1762_v8 }
 0x177   : > { %1780 = vrot.lane.b32.xlu1 %v1779_v57, %s1824_s24  ;;  %v692_v57 = vrot.slane %v687_v52, 4 }
 0x178   : > { %928 = vrot.lane.b32.xlu2 %v721_v14, %s1818_s12 }
 0x179   : > { %v693_v5 = vsel %vm556_vm1, %v692_v57, %v675_v63 }
 0x17a   : > { %v2249_v34 = vperm.slane %v693_v5, %v2058_v49 }
 0x17c   : > { %v716_v4 = vrot.slane %v2249_v34, 4 }
 0x17d   : > { %984 = vrot.lane.b32.xlu0 %v889_v28, %s1818_s12 }
 0x17e   : > { %v717_v25 = vsel %vm556_vm1, 0.0, %v716_v4 }
 0x17f   : > { %548 = vperm.xlu1 %1790, %v521_v7  }
 0x180   : > { %944 = vrot.lane.b32.xlu2 %v723_v46, %s1825_s27  ;;  %v1757_v46 = vunpack.i.l.bf16 %v2264_v55 }
 0x185   : > { %952 = vrot.lane.b32.xlu0 %v885_v15, %s1819_s13 }
 0x187   : > { %532 = vperm.xlu1 %1790, %v517_v33  }
 0x188   : > { %912 = vrot.lane.b32.xlu2 %v719_v40, %s1821_s20  ;;  %v1758_v40 = vunpack.i.h.bf16 %v2264_v55 }
 0x18d   : > { %896 = vrot.lane.b32.xlu0 %v717_v25, %s1819_s13 }
 0x18f   : > { %544 = vperm.xlu1 %1790, %v520_v20  }
 0x190   : > { %1785 = vrot.lane.b32.xlu2 %v1784_v22, %s1825_s27  ;;  %v1766_v22 = vpop.permute.xlu1 %1765 }
 0x191   : > { %v1767_v28 = vunpack.i.l.bf16 %v1766_v22  ;;  %v1768_v5 = vunpack.i.h.bf16 %v1766_v22  ;;  %v481_v22 = vld [vmem:[%s2560_s2] sm:$0xff] }
 0x195   : > { %1000 = vrot.lane.b32.xlu0 %v891_v17, %s1825_s27 }
 0x198   : > { %528 = vperm.xlu2 %1791, %v516_v59   ;;  %v1771_v18 = vpop.permute.xlu1 %1770 }
 0x199   : > { %v1772_v23 = vunpack.i.l.bf16 %v1771_v18 }
 0x19d   : > { %536 = vperm.xlu0 %1789, %v518_v2  }
 0x1a0   : > { %552 = vperm.xlu2 %1791, %v522_v43   ;;  %v1776_v39 = vpop.permute.xlu1 %1775 }
 0x1a1   : > { %v1777_v36 = vunpack.i.l.bf16 %v1776_v39  ;;  %v1778_v12 = vunpack.i.h.bf16 %v1776_v39 }
 0x1a3   : > { %v1007_v14 = vsel %vm1006_vm2, %v1004_v11, %v1777_v36  ;;  %v1026_v7 = vsel %vm1006_vm2, %v1024_v24, %v1778_v12 }
 0x1a4   : > { %v1010_v19 = vsel %vm1009_vm3, %v1007_v14, %v1772_v23 }
 0x1a5   : > { %540 = vperm.xlu0 %1789, %v519_v45   ;;  %v1013_v53 = vsel %vm1012_vm4, %v1010_v19, %v1767_v28 }
 0x1a8   : > { %524 = vperm.xlu2 %1791, %v515_v47  }
 0x1c2   : > { %v921_v48 = vpop.permute.xlu2 %920 }
 0x1ca   : > { %v937_v51 = vpop.permute.xlu2 %936 }
 0x1d2   : > { %v929_v0 = vpop.permute.xlu2 %928 }
 0x1d7   : > { %v2266_v50 = vpop.permute.xlu0 %992 }
 0x1d9   : > { %v961_v60 = vpop.permute.xlu1 %960 }
 0x1da   : > { %v945_v58 = vpop.permute.xlu2 %944 }
 0x1df   : > { %v977_v61 = vpop.permute.xlu0 %976 }
 0x1e1   : > { %v905_v26 = vpop.permute.xlu1 %904 }
 0x1e2   : > { %v913_v63 = vpop.permute.xlu2 %912 }
 0x1e7   : > { %v969_v1 = vpop.permute.xlu0 %968 }
 0x1e9   : > { %v1781_v38 = vpop.permute.xlu1 %1780 }
 0x1ea   : > { %v2268_v52 = vpop.permute.xlu2 %1785  ;;  %v1782_v32 = vunpack.i.l.bf16 %v1781_v38  ;;  %v1783_v20 = vunpack.i.h.bf16 %v1781_v38 }
 0x1eb   : > { %v1787_v17 = vunpack.i.l.bf16 %v2268_v52  ;;  %v1788_v43 = vunpack.i.h.bf16 %v2268_v52 }
 0x1ef   : > { %v985_v6 = vpop.permute.xlu0 %984 }
 0x1f1   : > { %v2276_v13 = vpop.permute.xlu1 %548 }
 0x1f2   : > { %v2270_v9 = vpop.permute.xlu2 %528  ;;  %v1062_v14 = vrot.slane %v2276_v13, 4 }
 0x1f3   : > { %v1052_v38 = vrot.slane %v2270_v9, 4 }
 0x1f7   : > { %v953_v62 = vpop.permute.xlu0 %952 }
 0x1f8   : > { %v1025_v56 = vsel %vm268_vm0, %v2240_v30, %v953_v62  ;;  %v1773_v30 = vunpack.i.h.bf16 %v1771_v18 }
 0x1f9   : > { %v1027_v54 = vsel %vm1006_vm2, %v1025_v56, %v961_v60  ;;  %v533_v25 = vpop.permute.xlu1 %532 }
 0x1fa   : > { %v1029_v37 = vsel %vm1009_vm3, %v1027_v54, %v969_v1  ;;  %v1028_v57 = vsel %vm1009_vm3, %v1026_v7, %v1773_v30  ;;  %v553_v29 = vpop.permute.xlu2 %552  ;;  %v1038_v18 = vrot.slane %v533_v25, 4 }
 0x1fb   : > { %v1031_v15 = vsel %vm1012_vm4, %v1029_v37, %v977_v61  ;;  %v1030_v16 = vsel %vm1012_vm4, %v1028_v57, %v1768_v5  ;;  %v1074_v60 = vrot.slane %v553_v29, 4 }
 0x1fc   : > { %v1033_v41 = vsel %vm1015_vm5, %v1031_v15, %v985_v6  ;;  %v1032_v45 = vsel %vm1015_vm5, %v1030_v16, %v1758_v40 }
 0x1fd   : > { %v1035_v55 = vsel %vm1018_vm6, %v1033_v41, %v2266_v50  ;;  %v1034_v27 = vsel %vm1018_vm6, %v1032_v45, %v1783_v20 }
 0x1ff   : > { %v897_v21 = vpop.permute.xlu0 %896 }
 0x200   : > { %v1005_v31 = vsel %vm268_vm0, %v2249_v34, %v897_v21  ;;  %v1016_v34 = vsel %vm1015_vm5, %v1013_v53, %v1757_v46 }
 0x201   : > { %v1008_v33 = vsel %vm1006_vm2, %v1005_v31, %v905_v26  ;;  %v1019_v2 = vsel %vm1018_vm6, %v1016_v34, %v1782_v32  ;;  %v545_v50 = vpop.permute.xlu1 %544 }
 0x202   : > { %v1011_v4 = vsel %vm1009_vm3, %v1008_v33, %v913_v63  ;;  %v525_v39 = vpop.permute.xlu2 %524  ;;  %v1076_v63 = vrot.slane %v545_v50, 4  ;;  %v1075_v52 = vsel %vm556_vm1, %v1074_v60, %v545_v50 }
 0x203   : > { %v1014_v10 = vsel %vm1012_vm4, %v1011_v4, %v921_v48  ;;  %v1022_v48 = vsel %vm1021_vm8, %v1019_v2, %v1787_v17  ;;  %v1081_v3 = vperm.slane %v1075_v52, %v1958_v35  ;;  %v1040_v56 = vrot.slane %v525_v39, 4 }
 0x204   : > { %v1017_v59 = vsel %vm1015_vm5, %v1014_v10, %v929_v0  ;;  %v1036_v0 = vsel %vm1021_vm8, %v1034_v27, %v1788_v43  ;;  %v1077_v36 = vsel %vm556_vm1, %v553_v29, %v1076_v63 }
 0x205   : > { %v1020_v42 = vsel %vm1018_vm6, %v1017_v59, %v937_v51  ;;  %v1085_v54 = vperm.slane %v1077_v36, %v1958_v35  ;;  %v1110_v37 = vrot.slane %v1081_v3, 4  ;;  %v1041_v46 = vsel %vm556_vm1, %v533_v25, %v1040_v56 }
 0x206   : > { %v1023_v44 = vsel %vm1021_vm8, %v1020_v42, %v945_v58  ;;  %v1039_v58 = vsel %vm556_vm1, %v1038_v18, %v525_v39  ;;  %v1049_v15 = vperm.slane %v1041_v46, %v1958_v35 }
 0x207   : > { %1705 = vmatpush.msk.msrb.mxu2 %vm1189_vm7, %v1023_v44  ;;  %v1001_v47 = vpop.permute.xlu0 %1000  ;;  %v1045_v26 = vperm.slane %v1039_v58, %v1958_v35  ;;  %v1122_v53 = vrot.slane %v1085_v54, 4 }
 0x208   : > { %v1037_v51 = vsel %vm1021_vm8, %v1035_v55, %v1001_v47  ;;  %v1100_v44 = vrot.slane %v1049_v15, 4 }
 0x209   : > { %1211 = vmatpush.msrb.mxu2 %v1022_v48  ;;  %1707 = vmatpush.msk.msrb.mxu3 %vm1189_vm7, %v1037_v51  ;;  %v1088_v62 = vrot.slane %v1045_v26, 4 }
 0x20a   : > { %1706 = vmatmul.msk.f32.vlgmr.msrb.gmra.mxu2 %vm1185_vm9, %v481_v22 }
 0x20b   : > { %1231 = vmatpush.msrb.mxu3 %v1036_v0 }
 0x20c   : > { %1708 = vmatmul.msk.f32.vlgmr.msrb.gmra.mxu3 %vm1185_vm9, %v481_v22 }
 0x20f   : > { %v537_v61 = vpop.permute.xlu0 %536 }
 0x210   : > { %v1050_v1 = vrot.slane %v537_v61, 4  ;;  %v1053_v11 = vsel %vm556_vm1, %v537_v61, %v1052_v38 }
 0x211   : > { %v1061_v19 = vperm.slane %v1053_v11, %v1958_v35 }
 0x212   : > { %v1051_v6 = vsel %vm556_vm1, %v1050_v1, %v2270_v9 }
 0x213   : > { %v1057_v8 = vperm.slane %v1051_v6, %v1958_v35  ;;  %v1098_v40 = vrot.slane %v1061_v19, 4  ;;  %v1101_v22 = vsel %vm556_vm1, %v1061_v19, %v1100_v44 }
 0x214   : > { %v1109_v0 = vperm.slane %v1101_v22, %v2058_v49 }
 0x215   : > { %v1086_v12 = vrot.slane %v1057_v8, 4  ;;  %v1089_v23 = vsel %vm556_vm1, %v1057_v8, %v1088_v62  ;;  %v1099_v45 = vsel %vm556_vm1, %v1098_v40, %v1049_v15 }
 0x216   : > { %v1097_v57 = vperm.slane %v1089_v23, %v2058_v49  ;;  %v1105_v48 = vperm.slane %v1099_v45, %v2058_v49  ;;  %v1148_v60 = vrot.slane %v1109_v0, 4 }
 0x217   : > { %v541_v24 = vpop.permute.xlu0 %540  ;;  %v1087_v9 = vsel %vm556_vm1, %v1086_v12, %v1045_v26 }
 0x218   : > { %v1063_v7 = vsel %vm556_vm1, %v1062_v14, %v541_v24  ;;  %v1064_v28 = vrot.slane %v541_v24, 4  ;;  %v1093_v30 = vperm.slane %v1087_v9, %v2058_v49  ;;  %v1140_v10 = vrot.slane %v1097_v57, 4 }
 0x219   : > { %v1069_v21 = vperm.slane %v1063_v7, %v1958_v35  ;;  %v1144_v50 = vrot.slane %v1105_v48, 4 }
 0x21a   : > { %v1065_v31 = vsel %vm556_vm1, %v2276_v13, %v1064_v28  ;;  %v1136_v4 = vrot.slane %v1093_v30, 4 }
 0x21b   : > { %v1073_v5 = vperm.slane %v1065_v31, %v1958_v35  ;;  %v1112_v32 = vrot.slane %v1069_v21, 4  ;;  %v1111_v33 = vsel %vm556_vm1, %v1110_v37, %v1069_v21 }
 0x21c   : > { %v1117_v29 = vperm.slane %v1111_v33, %v2058_v49 }
 0x21d   : > { %v1124_v20 = vrot.slane %v1073_v5, 4  ;;  %v1113_v25 = vsel %vm556_vm1, %v1081_v3, %v1112_v32  ;;  %v1123_v34 = vsel %vm556_vm1, %v1122_v53, %v1073_v5 }
 0x21e   : > { %v1137_v13 = vsel %vm556_vm1, %v1117_v29, %v1136_v4  ;;  %v1134_v16 = vrot.slane %v1117_v29, 4  ;;  %v1121_v17 = vperm.slane %v1113_v25, %v2058_v49  ;;  %v1129_v59 = vperm.slane %v1123_v34, %v2058_v49 }
 0x21f   : > { %1151 = vrot.lane.b32.xlu0 %v1137_v13, %s1819_s13  ;;  %v1125_v41 = vsel %vm556_vm1, %v1085_v54, %v1124_v20 }
 0x220   : > { %v1141_v42 = vsel %vm556_vm1, %v1121_v17, %v1140_v10  ;;  %v1138_v2 = vrot.slane %v1121_v17, 4  ;;  %v1133_v43 = vperm.slane %v1125_v41, %v2058_v49  ;;  %v1135_v47 = vsel %vm556_vm1, %v1134_v16, %v1093_v30 }
 0x221   : > { %1159 = vrot.lane.b32.xlu2 %v1141_v42, %s1821_s20  ;;  %v1142_v27 = vrot.slane %v1129_v59, 4  ;;  %v1145_v58 = vsel %vm556_vm1, %v1129_v59, %v1144_v50 }
 0x222   : > { %v1139_v55 = vsel %vm556_vm1, %v1138_v2, %v1097_v57  ;;  %v1146_v51 = vrot.slane %v1133_v43, 4  ;;  %v1149_v61 = vsel %vm556_vm1, %v1133_v43, %v1148_v60 }
 0x223   : > { %1155 = vrot.lane.b32.xlu1 %v1139_v55, %s1822_s21  ;;  %v1143_v18 = vsel %vm556_vm1, %v1142_v27, %v1105_v48 }
 0x224   : > { %v1147_v39 = vsel %vm556_vm1, %v1146_v51, %v1109_v0 }
 0x227   : > { %1163 = vrot.lane.b32.xlu0 %v1143_v18, %s1820_s14 }
 0x229   : > { %1171 = vrot.lane.b32.xlu2 %v1147_v39, %s1824_s24 }
 0x22b   : > { %1167 = vrot.lane.b32.xlu1 %v1145_v58, %s1818_s12 }
 0x22f   : > { %1175 = vrot.lane.b32.xlu0 %v1149_v61, %s1825_s27 }
 0x27b   : > { %v1160_v1 = vpop.permute.xlu2 %1159 }
 0x283   : > { %v1172_v56 = vpop.permute.xlu2 %1171 }
 0x28d   : > { %v1213_v24 = vpop.f32.mrf.mxu2 }
 0x28f   : > { %v1233_v11 = vpop.f32.mrf.mxu3 }
 0x291   : > { %v1152_v63 = vpop.permute.xlu0 %1151 }
 0x292   : > { %v1178_v52 = vsel %vm268_vm0, %v1135_v47, %v1152_v63 }
 0x295   : > { %v1156_v26 = vpop.permute.xlu1 %1155 }
 0x296   : > { %v1179_v6 = vsel %vm1006_vm2, %v1178_v52, %v1156_v26 }
 0x297   : > { %v1180_v8 = vsel %vm1009_vm3, %v1179_v6, %v1160_v1 }
 0x299   : > { %v1164_v38 = vpop.permute.xlu0 %1163 }
 0x29a   : > { %v1181_v36 = vsel %vm1012_vm4, %v1180_v8, %v1164_v38 }
 0x29d   : > { %v1168_v62 = vpop.permute.xlu1 %1167 }
 0x29e   : > { %v1182_v3 = vsel %vm1015_vm5, %v1181_v36, %v1168_v62 }
 0x29f   : > { %v1183_v14 = vsel %vm1018_vm6, %v1182_v3, %v1172_v56 }
 0x2a1   : > { %v1176_v12 = vpop.permute.xlu0 %1175 }
 0x2a2   : > { %v1184_v23 = vsel %vm1021_vm8, %v1183_v14, %v1176_v12 }
 0x2a3   : > { %v1234_v54 = vadd.f32 %v1233_v11, %v1184_v23  ;;  %v1214_v9 = vadd.f32 %v1213_v24, %v1184_v23 }
 0x2a5   : > { %1265 = vrot.lane.b32.xlu1 %v1234_v54, %s1818_s12  ;;  %1262 = vrot.lane.b32.xlu0 %v1234_v54, %s1824_s24  ;;  %v1394_v33 = vrot.slane %v1234_v54, 4  ;;  %v1282_v10 = vrot.slane %v1214_v9, 4 }
 0x2a6   : > { %1259 = vrot.lane.b32.xlu2 %v1234_v54, %s1825_s27 }
 0x2ad   : > { %1243 = vrot.lane.b32.xlu0 %v1214_v9, %s1818_s12  ;;  %1237 = vrot.lane.b32.xlu1 %v1214_v9, %s1825_s27 }
 0x2ae   : > { %1268 = vrot.lane.b32.xlu2 %v1234_v54, %s1820_s14 }
 0x2b5   : > { %1252 = vrot.lane.b32.xlu0 %v1214_v9, %s1822_s21  ;;  %1246 = vrot.lane.b32.xlu1 %v1214_v9, %s1820_s14 }
 0x2b6   : > { %1240 = vrot.lane.b32.xlu2 %v1214_v9, %s1824_s24 }
 0x2bd   : > { %1271 = vrot.lane.b32.xlu0 %v1234_v54, %s1821_s20  ;;  %1255 = vrot.lane.b32.xlu1 %v1214_v9, %s1819_s13 }
 0x2be   : > { %1249 = vrot.lane.b32.xlu2 %v1214_v9, %s1821_s20 }
 0x2c5   : > { %1274 = vrot.lane.b32.xlu1 %v1234_v54, %s1822_s21 }
 0x2c6   : > { %1277 = vrot.lane.b32.xlu2 %v1234_v54, %s1819_s13 }
 0x300   : > { %v1260_v19 = vpop.permute.xlu2 %1259 }
 0x301   : > { %v1406_v46 = vrot.slane %v1260_v19, 4 }
 0x308   : > { %v2388_v7 = vpop.permute.xlu2 %1268 }
 0x309   : > { %v1418_v1 = vrot.slane %v2388_v7, 4 }
 0x310   : > { %v1241_v37 = vpop.permute.xlu2 %1240 }
 0x311   : > { %v1280_v32 = vrot.slane %v1241_v37, 4  ;;  %v1283_v41 = vsel %vm556_vm1, %v1241_v37, %v1282_v10 }
 0x312   : > { %v1291_v51 = vperm.slane %v1283_v41, %v1958_v35 }
 0x313   : > { %v1281_v17 = vsel %vm556_vm1, %v1280_v32, %v1214_v9 }
 0x314   : > { %v1287_v27 = vperm.slane %v1281_v17, %v1958_v35  ;;  %v1342_v52 = vrot.slane %v1291_v51, 4 }
 0x316   : > { %v1330_v63 = vrot.slane %v1287_v27, 4 }
 0x317   : > { %v1266_v28 = vpop.permute.xlu1 %1265  ;;  %v1263_v30 = vpop.permute.xlu0 %1262 }
 0x318   : > { %v1404_v21 = vrot.slane %v1266_v28, 4  ;;  %v1392_v57 = vrot.slane %v1263_v30, 4  ;;  %v1407_v5 = vsel %vm556_vm1, %v1266_v28, %v1406_v46  ;;  %v1395_v25 = vsel %vm556_vm1, %v1263_v30, %v1394_v33  ;;  %v1250_v34 = vpop.permute.xlu2 %1249 }
 0x319   : > { %v1415_v4 = vperm.slane %v1407_v5, %v1958_v35  ;;  %v1403_v2 = vperm.slane %v1395_v25, %v1958_v35  ;;  %v1318_v38 = vrot.slane %v1250_v34, 4 }
 0x31a   : > { %v1405_v29 = vsel %vm556_vm1, %v1404_v21, %v1260_v19  ;;  %v1393_v20 = vsel %vm556_vm1, %v1392_v57, %v1234_v54 }
 0x31b   : > { %v1411_v59 = vperm.slane %v1405_v29, %v1958_v35  ;;  %v1399_v42 = vperm.slane %v1393_v20, %v1958_v35  ;;  %v1452_v43 = vrot.slane %v1415_v4, 4  ;;  %v1454_v39 = vrot.slane %v1403_v2, 4 }
 0x31d   : > { %v1440_v18 = vrot.slane %v1411_v59, 4  ;;  %v1442_v0 = vrot.slane %v1399_v42, 4  ;;  %v1453_v50 = vsel %vm556_vm1, %v1452_v43, %v1403_v2  ;;  %v2412_v8 = vsel %vm556_vm1, %v1415_v4, %v1454_v39 }
 0x31e   : > { %v2415_v36 = vperm.slane %v1453_v50, %v2058_v49 }
 0x31f   : > { %v1244_v31 = vpop.permute.xlu0 %1243  ;;  %v1238_v53 = vpop.permute.xlu1 %1237  ;;  %v1441_v6 = vsel %vm556_vm1, %v1440_v18, %v1399_v42  ;;  %v1443_v11 = vsel %vm556_vm1, %v1411_v59, %v1442_v0 }
 0x320   : > { %v1292_v15 = vrot.slane %v1244_v31, 4  ;;  %v1294_v40 = vrot.slane %v1238_v53, 4  ;;  %v1278_v62 = vpop.permute.xlu2 %1277  ;;  %v2424_v9 = vperm.slane %v1441_v6, %v2058_v49  ;;  %v2436_v4 = vperm.slane %v1443_v11, %v2058_v49 }
 0x321   : > { %v1428_v37 = vrot.slane %v1278_v62, 4 }
 0x322   : > { %v1293_v13 = vsel %vm556_vm1, %v1292_v15, %v1238_v53  ;;  %v1295_v16 = vsel %vm556_vm1, %v1244_v31, %v1294_v40 }
 0x323   : > { %v1299_v44 = vperm.slane %v1293_v13, %v1958_v35  ;;  %v1303_v45 = vperm.slane %v1295_v16, %v1958_v35 }
 0x325   : > { %v1328_v58 = vrot.slane %v1299_v44, 4  ;;  %v1340_v60 = vrot.slane %v1303_v45, 4  ;;  %v1331_v3 = vsel %vm556_vm1, %v1299_v44, %v1330_v63  ;;  %v1343_v21 = vsel %vm556_vm1, %v1303_v45, %v1342_v52 }
 0x326   : > { %v1339_v46 = vperm.slane %v1331_v3, %v2058_v49  ;;  %v1351_v20 = vperm.slane %v1343_v21, %v2058_v49 }
 0x327   : > { %v1253_v47 = vpop.permute.xlu0 %1252  ;;  %v1247_v55 = vpop.permute.xlu1 %1246  ;;  %v1329_v12 = vsel %vm556_vm1, %v1328_v58, %v1287_v27  ;;  %v1341_v14 = vsel %vm556_vm1, %v1340_v60, %v1291_v51 }
 0x328   : > { %v1304_v22 = vrot.slane %v1253_v47, 4  ;;  %v1306_v48 = vrot.slane %v1247_v55, 4  ;;  %v1335_v31 = vperm.slane %v1329_v12, %v2058_v49  ;;  %v1347_v53 = vperm.slane %v1341_v14, %v2058_v49 }
 0x329   : > { %v1382_v13 = vrot.slane %v1339_v46, 4  ;;  %v1390_v18 = vrot.slane %v1351_v20, 4 }
 0x32a   : > { %v1307_v61 = vsel %vm556_vm1, %v1253_v47, %v1306_v48  ;;  %v1305_v26 = vsel %vm556_vm1, %v1304_v22, %v1247_v55  ;;  %v1378_v43 = vrot.slane %v1335_v31, 4  ;;  %v1386_v44 = vrot.slane %v1347_v53, 4 }
 0x32b   : > { %v1315_v56 = vperm.slane %v1307_v61, %v1958_v35  ;;  %v1311_v23 = vperm.slane %v1305_v26, %v1958_v35 }
 0x32d   : > { %v1366_v5 = vrot.slane %v1315_v56, 4  ;;  %v1354_v33 = vrot.slane %v1311_v23, 4 }
 0x32f   : > { %v1272_v54 = vpop.permute.xlu0 %1271  ;;  %v1256_v24 = vpop.permute.xlu1 %1255 }
 0x330   : > { %v1430_v19 = vrot.slane %v1272_v54, 4  ;;  %v1316_v28 = vrot.slane %v1256_v24, 4  ;;  %v1319_v30 = vsel %vm556_vm1, %v1256_v24, %v1318_v38  ;;  %v1429_v15 = vsel %vm556_vm1, %v1428_v37, %v1272_v54 }
 0x331   : > { %v1327_v57 = vperm.slane %v1319_v30, %v1958_v35  ;;  %v1435_v59 = vperm.slane %v1429_v15, %v1958_v35  ;;  %v1463_v54 = vperm.slane %v2412_v8, %v2058_v49  ;;  %v1490_v24 = vrot.slane %v2424_v9, 4 }
 0x332   : > { %v1317_v32 = vsel %vm556_vm1, %v1316_v28, %v1250_v34  ;;  %v1431_v25 = vsel %vm556_vm1, %v1278_v62, %v1430_v19  ;;  %v1494_v28 = vrot.slane %v2436_v4, 4  ;;  %v1498_v30 = vrot.slane %v2415_v36, 4 }
 0x333   : > { %v1323_v40 = vperm.slane %v1317_v32, %v1958_v35  ;;  %v1364_v29 = vrot.slane %v1327_v57, 4  ;;  %v1367_v10 = vsel %vm556_vm1, %v1327_v57, %v1366_v5  ;;  %v1439_v45 = vperm.slane %v1431_v25, %v1958_v35 }
 0x334   : > { %v1375_v2 = vperm.slane %v1367_v10, %v2058_v49  ;;  %v1464_v58 = vrot.slane %v1435_v59, 4 }
 0x335   : > { %v1352_v16 = vrot.slane %v1323_v40, 4  ;;  %v1355_v34 = vsel %vm556_vm1, %v1323_v40, %v1354_v33  ;;  %v1365_v17 = vsel %vm556_vm1, %v1364_v29, %v1315_v56  ;;  %v1476_v26 = vrot.slane %v1439_v45, 4 }
 0x336   : > { %v1363_v41 = vperm.slane %v1355_v34, %v2058_v49  ;;  %v1371_v42 = vperm.slane %v1365_v17, %v2058_v49  ;;  %v1388_v39 = vrot.slane %v1375_v2, 4  ;;  %v1391_v12 = vsel %vm556_vm1, %v1375_v2, %v1390_v18 }
 0x337   : > { %v1353_v47 = vsel %vm556_vm1, %v1352_v16, %v1311_v23  ;;  %v1275_v55 = vpop.permute.xlu1 %1274  ;;  %1518 = vst.msk [vmem:[%s2454_s15 + $0x70] sm:$0xff] %vm268_vm0, %v1391_v12  ;;  %v1502_v40 = vrot.slane %v1463_v54, 4 }
 0x338   : > { %v1359_v27 = vperm.slane %v1353_v47, %v2058_v49  ;;  %v1380_v22 = vrot.slane %v1363_v41, 4  ;;  %v1383_v48 = vsel %vm556_vm1, %v1363_v41, %v1382_v13  ;;  %v1384_v51 = vrot.slane %v1371_v42, 4 }
 0x339   : > { %v1387_v0 = vsel %vm556_vm1, %v1371_v42, %v1386_v44  ;;  %1510 = vst.msk [vmem:[%s2454_s15 + $0x30] sm:$0xff] %vm268_vm0, %v1383_v48  ;;  %v1416_v50 = vrot.slane %v1275_v55, 4  ;;  %v1419_v38 = vsel %vm556_vm1, %v1275_v55, %v1418_v1  ;;  %v1389_v3 = vsel %vm556_vm1, %v1388_v39, %v1351_v20 }
 0x33a   : > { %v1376_v60 = vrot.slane %v1359_v27, 4  ;;  %v1379_v61 = vsel %vm556_vm1, %v1359_v27, %v1378_v43  ;;  %v1381_v63 = vsel %vm556_vm1, %v1380_v22, %v1339_v46  ;;  %1514 = vst.msk [vmem:[%s2454_s15 + $0x50] sm:$0xff] %vm268_vm0, %v1387_v0  ;;  %v1385_v52 = vsel %vm556_vm1, %v1384_v51, %v1347_v53 }
 0x33b   : > { %1506 = vst.msk [vmem:[%s2454_s15 + $0x10] sm:$0xff] %vm268_vm0, %v1379_v61  ;;  %v1417_v6 = vsel %vm556_vm1, %v1416_v50, %v2388_v7  ;;  %v1427_v11 = vperm.slane %v1419_v38, %v1958_v35 }
 0x33c   : > { %v1377_v62 = vsel %vm556_vm1, %v1376_v60, %v1335_v31  ;;  %1508 = vst.msk [vmem:[%s2454_s15 + $0x20] sm:$0xff] %vm268_vm0, %v1381_v63  ;;  %v1423_v56 = vperm.slane %v1417_v6, %v1958_v35 }
 0x33d   : > { %1504 = vst.msk [vmem:[%s2454_s15] sm:$0xff] %vm268_vm0, %v1377_v62  ;;  %v1477_v14 = vsel %vm556_vm1, %v1476_v26, %v1427_v11  ;;  %v1478_v23 = vrot.slane %v1427_v11, 4 }
 0x33e   : > { %1512 = vst.msk [vmem:[%s2454_s15 + $0x40] sm:$0xff] %vm268_vm0, %v1385_v52  ;;  %v1465_v7 = vsel %vm556_vm1, %v1464_v58, %v1423_v56  ;;  %v1466_v1 = vrot.slane %v1423_v56, 4  ;;  %v1483_v19 = vperm.slane %v1477_v14, %v2058_v49  ;;  %v1616_v47 = vld [vmem:[%s2454_s15 + $0x70] sm:$0xff] (%p1881_p5) }
 0x33f   : > { %1516 = vst.msk [vmem:[%s2454_s15 + $0x60] sm:$0xff] %vm268_vm0, %v1389_v3  ;;  %v1471_v35 = vperm.slane %v1465_v7, %v2058_v49  ;;  %v1479_v8 = vsel %vm556_vm1, %v1439_v45, %v1478_v23 }
 0x340   : > { %v1467_v37 = vsel %vm556_vm1, %v1435_v59, %v1466_v1  ;;  %v1487_v21 = vperm.slane %v1479_v8, %v2058_v49  ;;  %v1496_v53 = vrot.slane %v1483_v19, 4  ;;  %v1499_v5 = vsel %vm556_vm1, %v1483_v19, %v1498_v30  ;;  %v1600_v17 = vld [vmem:[%s2454_s15 + $0x30] sm:$0xff] (%p1881_p5)  ;;  %1617 = vst [vmem:[%s1529_s23 + $0xe0] sm:$0xff] (%p1881_p5), %v1616_v47 }
 0x341   : > { %v1475_v46 = vperm.slane %v1467_v37, %v2058_v49  ;;  %v1488_v57 = vrot.slane %v1471_v35, 4  ;;  %v1491_v31 = vsel %vm556_vm1, %v1471_v35, %v1490_v24  ;;  %1515 = vst.msk [vmem:[%s2454_s15 + $0x58] sm:$0xff] %vm268_vm0, %v1499_v5  ;;  %v1608_v2 = vld [vmem:[%s2454_s15 + $0x50] sm:$0xff] (%p1881_p5) }
 0x342   : > { %1507 = vst.msk [vmem:[%s2454_s15 + $0x18] sm:$0xff] %vm268_vm0, %v1491_v31  ;;  %v1500_v49 = vrot.slane %v1487_v21, 4  ;;  %v1497_v29 = vsel %vm556_vm1, %v1496_v53, %v2415_v36  ;;  %v1592_v10 = vld [vmem:[%s2454_s15 + $0x10] sm:$0xff] (%p1881_p5) }
 0x343   : > { %v1489_v32 = vsel %vm556_vm1, %v1488_v57, %v2424_v9  ;;  %v1492_v33 = vrot.slane %v1475_v46, 4  ;;  %v1495_v15 = vsel %vm556_vm1, %v1475_v46, %v1494_v28  ;;  %v1503_v9 = vsel %vm556_vm1, %v1487_v21, %v1502_v40  ;;  %1513 = vst.msk [vmem:[%s2454_s15 + $0x48] sm:$0xff] %vm268_vm0, %v1497_v29  ;;  %v1596_v16 = vld [vmem:[%s2454_s15 + $0x20] sm:$0xff] (%p1881_p5) }
 0x344   : > { %1505 = vst.msk [vmem:[%s2454_s15 + $0x8] sm:$0xff] %vm268_vm0, %v1489_v32  ;;  %v1501_v25 = vsel %vm556_vm1, %v1500_v49, %v1463_v54  ;;  %1526 = sbr.rel (!%p1881_p5) target bundleno = 856 (0x358), region = 78  ;;  %v1588_v36 = vld [vmem:[%s2454_s15] sm:$0xff] (%p1881_p5) }
 0x345   : > { %v1493_v20 = vsel %vm556_vm1, %v1492_v33, %v2436_v4  ;;  %1511 = vst.msk [vmem:[%s2454_s15 + $0x38] sm:$0xff] %vm268_vm0, %v1495_v15  ;;  %v1604_v41 = vld [vmem:[%s2454_s15 + $0x40] sm:$0xff] (%p1881_p5) }
 0x346   : > { %1509 = vst.msk [vmem:[%s2454_s15 + $0x28] sm:$0xff] %vm268_vm0, %v1493_v20  ;;  %v1612_v44 = vld [vmem:[%s2454_s15 + $0x60] sm:$0xff] (%p1881_p5) }
 0x347   : > { %1517 = vst.msk [vmem:[%s2454_s15 + $0x68] sm:$0xff] %vm268_vm0, %v1501_v25 }
 0x348   : > { %1519 = vst.msk [vmem:[%s2454_s15 + $0x78] sm:$0xff] %vm268_vm0, %v1503_v9  ;;  %v1610_v43 = vld [vmem:[%s2454_s15 + $0x58] sm:$0xff] (%p1881_p5) }
 0x349   : > { %1589 = vst [vmem:[%s1529_s23] sm:$0xff] %v1588_v36  ;;  %v1594_v13 = vld [vmem:[%s2454_s15 + $0x18] sm:$0xff] }
 0x34a   : > { %1593 = vst [vmem:[%s1529_s23 + $0x20] sm:$0xff] %v1592_v10  ;;  %v1606_v42 = vld [vmem:[%s2454_s15 + $0x48] sm:$0xff] }
 0x34b   : > { %v1590_v4 = vld [vmem:[%s2454_s15 + $0x8] sm:$0xff]  ;;  %1595 = vst [vmem:[%s1529_s23 + $0x28] sm:$0xff] %v1594_v13 }
 0x34c   : > { %1591 = vst [vmem:[%s1529_s23 + $0x8] sm:$0xff] %v1590_v4  ;;  %v1602_v59 = vld [vmem:[%s2454_s15 + $0x38] sm:$0xff] }
 0x34d   : > { %v1598_v34 = vld [vmem:[%s2454_s15 + $0x28] sm:$0xff]  ;;  %1597 = vst [vmem:[%s1529_s23 + $0x40] sm:$0xff] %v1596_v16 }
 0x34e   : > { %1599 = vst [vmem:[%s1529_s23 + $0x48] sm:$0xff] %v1598_v34  ;;  %v1614_v45 = vld [vmem:[%s2454_s15 + $0x68] sm:$0xff] }
 0x34f   : > { %1601 = vst [vmem:[%s1529_s23 + $0x60] sm:$0xff] %v1600_v17  ;;  %v1618_v55 = vld [vmem:[%s2454_s15 + $0x78] sm:$0xff] }
 0x350   : > { %1603 = vst [vmem:[%s1529_s23 + $0x68] sm:$0xff] %v1602_v59 }
 0x351   : > { %1605 = vst [vmem:[%s1529_s23 + $0x80] sm:$0xff] %v1604_v41 }
 0x352   : > { %1607 = vst [vmem:[%s1529_s23 + $0x88] sm:$0xff] %v1606_v42 }
 0x353   : > { %1609 = vst [vmem:[%s1529_s23 + $0xa0] sm:$0xff] %v1608_v2 }
 0x354   : > { %1611 = vst [vmem:[%s1529_s23 + $0xa8] sm:$0xff] %v1610_v43 }
 0x355   : > { %1613 = vst [vmem:[%s1529_s23 + $0xc0] sm:$0xff] %v1612_v44 }
 0x356   : > { %1615 = vst [vmem:[%s1529_s23 + $0xc8] sm:$0xff] %v1614_v45 }
 0x357   : > { %1619 = vst [vmem:[%s1529_s23 + $0xe8] sm:$0xff] %v1618_v55 }
 0x358 PF: > { %p11_p10 = scmp.ge.s32.totalorder %s1868_s19, 4   ;;  %s2564_s15 = smov %s1810_s16 }
 0x359   : > { %s2565_s16 = smov %s1879_s22  ;;  %s2566_s17 = smov %s1868_s19 }
 0x35a   :  { %13 = sbr.rel (!%p11_p10) target bundleno = 2 (0x2), region = 149 }

</bundles_post_ra>
